<compile_context>
chip_gen: v7x
topology: tpu7x:2x2x1
jax: 0.10.0
libtpu: 0.0.40
codegen_flags: <defaults>
</compile_context>

<pallas_src>
import numpy as np

import jax
import jax.numpy as jnp
from jax.experimental import pallas as pl
from jax.experimental.pallas import tpu as pltpu

_TM = 512                                # batch (N) tile
_TN = 512                                # output-channel tile (lane dim)
_LANE = 128
_SUBLANE = 16                            # bf16-native sublane tile (ok for f32 too)
_PIPELINE_BUDGET = 40 * 1024 * 1024      # double-buffered blocks must fit here
_VMEM_LIMIT_BYTES = 48 * 1024 * 1024     # <= v7x's 64 MiB with headroom
_MIN_PALLAS_BYTES = 4 * 1024 * 1024      # below this XLA's fused dot wins


def _round_up(x, m):
    return (x + m - 1) // m * m


def _footprint_bytes(tm, tn, k, x_bytes, w_bytes, out_bytes):
    # Double-buffered x / w / out blocks streamed by the Pallas pipeline.
    return 2 * (tm * k * x_bytes + k * tn * w_bytes + tm * tn * out_bytes)


def _conv1x1_kernel(x_ref, w_ref, o_ref):
    """One (tm, tn) output tile; the full C_in reduction is resident in VMEM."""
    o_ref[...] = jnp.dot(
        x_ref[...].astype(w_ref.dtype),       # in-kernel cast (no extra HBM pass)
        w_ref[...],
        preferred_element_type=jnp.float32,   # f32 MXU accumulation
    ).astype(o_ref.dtype)


def prepare_weight(weight_oihw, *, compute_dtype=jnp.bfloat16):
    """One-time (param-load-time) prep of the Conv2d weight.

    (C_out, C_in, 1, 1) -> (C_in, C_out_pad) in `compute_dtype`, with C_out
    zero-padded up to a multiple of 128 so the kernel's output stores stay
    lane-dense and the per-call forward never touches the weight again.
    """
    c_out, c_in = weight_oihw.shape[0], weight_oihw.shape[1]
    w2d = weight_oihw.reshape(c_out, c_in).T.astype(compute_dtype)  # (C_in, C_out)
    cout_pad = _round_up(c_out, _LANE)
    if cout_pad != c_out:
        w2d = jnp.pad(w2d, ((0, 0), (0, cout_pad - c_out)))
    return w2d


def normalized_conv(x, w2d, *, c_out=None, out_dtype=jnp.float32, use_pallas=None):
    """Forward of NormalizedConv: conv1x1(x, W).view(n, c).

    Args:
      x:       (N, C_in, 1, 1) or (N, C_in) activations (any float dtype).
      w2d:     (C_in, C_out_pad) weight from prepare_weight().
      c_out:   true number of output channels (defaults to w2d.shape[1]).
      out_dtype: jnp.float32 (default, matches PyTorch) or jnp.bfloat16 to
                 halve the output writeback when the consumer allows it.
      use_pallas: None = auto (small problems fall back to XLA's fused dot).

    Returns:
      (N, c_out) array in out_dtype, identical to `conv(x).view(n, c)`.
    """
    if x.ndim == 4:
        n, c_in, h, w = x.shape
        assert h == 1 and w == 1, "view(n, c) in the reference requires H == W == 1"
        x2d = x.reshape(n, c_in)              # metadata-only reshape, no HBM pass
    else:
        x2d = x
        n, c_in = x2d.shape
    assert w2d.shape[0] == c_in, "weight must come from prepare_weight()"
    cout_pad = w2d.shape[1]
    if c_out is None:
        c_out = cout_pad

    x_bytes = x2d.dtype.itemsize
    w_bytes = w2d.dtype.itemsize
    out_bytes = jnp.dtype(out_dtype).itemsize
    total_bytes = (n * c_in * x_bytes + c_in * cout_pad * w_bytes
                   + n * cout_pad * out_bytes)

    if use_pallas is None:
        use_pallas = total_bytes >= _MIN_PALLAS_BYTES

    def _xla_fallback():
        y = jnp.dot(x2d.astype(w2d.dtype), w2d, preferred_element_type=jnp.float32)
        if c_out != cout_pad:
            y = y[:, :c_out]
        return y.astype(out_dtype)

    if not use_pallas:
        return _xla_fallback()

    # ---- tile selection ------------------------------------------------------
    # tm == n is a legal full-dim block; otherwise tm is a multiple of 16.
    tm = _TM if n >= _TM else n
    # Single lane-dense block over C_out when it is modest, else 512-wide tiles.
    tn = cout_pad if cout_pad <= 2 * _TN else _TN

    # Shrink tiles until the double-buffered pipeline fits the VMEM budget
    # (same budget works for v5e/v6e 128 MiB and v7x 64 MiB VMEM).
    while _footprint_bytes(tm, tn, c_in, x_bytes, w_bytes, out_bytes) > _PIPELINE_BUDGET:
        if tm >= tn and tm > _LANE:
            tm = max(_LANE, _round_up(tm // 2, _SUBLANE))
        elif tn > _LANE:
            tn = max(_LANE, _round_up(tn // 2, _LANE))
        elif tm > _LANE:
            tm = max(_LANE, _round_up(tm // 2, _SUBLANE))
        else:
            break
    if _footprint_bytes(tm, tn, c_in, x_bytes, w_bytes, out_bytes) > _PIPELINE_BUDGET:
        # C_in too large to keep the reduction resident even at minimal tiles.
        # TODO(synk): add a K-tiled (3-D grid) path if such shapes ever appear.
        return _xla_fallback()

    # v7x has two TensorCores: keep >= 2 parallel blocks so neither idles
    # (prefer splitting the batch axis). No-op on v5e/v6e (single core).
    while (pl.cdiv(n, tm) * pl.cdiv(cout_pad, tn) < 2
           and n > _SUBLANE and tm > _SUBLANE):
        tm = max(_SUBLANE, _round_up((tm + 1) // 2, _SUBLANE))

    grid = (pl.cdiv(n, tm), pl.cdiv(cout_pad, tn))

    out = pl.pallas_call(
        _conv1x1_kernel,
        out_shape=jax.ShapeDtypeStruct((n, cout_pad), out_dtype),
        grid_spec=pltpu.PrefetchScalarGridSpec(
            num_scalar_prefetch=0,
            grid=grid,
            in_specs=[
                pl.BlockSpec((tm, c_in), lambda i, j: (i, 0)),   # activations
                pl.BlockSpec((c_in, tn), lambda i, j: (0, j)),   # weight
            ],
            out_specs=pl.BlockSpec((tm, tn), lambda i, j: (i, j)),
        ),
        compiler_params=pltpu.CompilerParams(
            dimension_semantics=("parallel", "parallel"),
            vmem_limit_bytes=_VMEM_LIMIT_BYTES,
        ),
        cost_estimate=pl.CostEstimate(
            flops=2 * n * c_in * cout_pad,
            transcendentals=0,
            bytes_accessed=total_bytes,
        ),
    )(x2d, w2d)

    if c_out != cout_pad:
        out = out[:, :c_out]
    return out


if __name__ == "__main__":
    key = jax.random.PRNGKey(0)
    k_x1, k_w1, k_x2, k_w2 = jax.random.split(key, 4)

    # --- Test 1: the module's literal small shape, f32 weights, Pallas forced --
    n1, cin1, cout1 = 2, 4, 8
    x1 = jax.random.normal(k_x1, (n1, cin1, 1, 1), dtype=jnp.float32)
    w1 = jax.random.normal(k_w1, (cout1, cin1, 1, 1), dtype=jnp.float32) * 0.1

    w1p = prepare_weight(w1, compute_dtype=jnp.float32)   # (4, 128): padded once
    y1 = jax.block_until_ready(
        normalized_conv(x1, w1p, c_out=cout1, use_pallas=True))
    y1_ref = (np.asarray(x1.reshape(n1, cin1), dtype=np.float64)
              @ np.asarray(w1.reshape(cout1, cin1), dtype=np.float64).T)
    assert y1.shape == (n1, cout1)
    # Tolerant of the MXU's default-precision f32 matmul at this tiny K.
    assert jnp.allclose(y1, y1_ref.astype(np.float32), atol=2e-2, rtol=2e-2)

    # Auto mode at this tiny size takes the XLA-dot fallback — same result.
    y1_fb = jax.block_until_ready(normalized_conv(x1, w1p, c_out=cout1))
    assert jnp.allclose(y1_fb, y1_ref.astype(np.float32), atol=2e-2, rtol=2e-2)

    # --- Test 2: multi-block parallel grid, bf16 weight, in-kernel bf16 cast ---
    n2, cin2, cout2 = 1024, 512, 640
    x2 = jax.random.normal(k_x2, (n2, cin2, 1, 1), dtype=jnp.float32)
    w2 = jax.random.normal(k_w2, (cout2, cin2, 1, 1), dtype=jnp.float32) * 0.03

    w2p = prepare_weight(w2)                       # bf16, one-time load-time prep
    y2 = jax.block_until_ready(normalized_conv(x2, w2p, c_out=cout2))
    y2_ref = (np.asarray(x2.reshape(n2, cin2), dtype=np.float64)
              @ np.asarray(w2.reshape(cout2, cin2), dtype=np.float64).T)
    assert y2.shape == (n2, cout2)
    assert jnp.allclose(y2, y2_ref.astype(np.float32), atol=5e-2, rtol=5e-2)

    # --- Test 3: bf16 output (halved writeback), same kernel -------------------
    y2_bf16 = jax.block_until_ready(
        normalized_conv(x2, w2p, c_out=cout2, out_dtype=jnp.bfloat16))
    assert y2_bf16.dtype == jnp.bfloat16
    assert jnp.allclose(y2_bf16.astype(jnp.float32), y2_ref.astype(np.float32),
                        atol=8e-2, rtol=8e-2)

    print("KERNEL_OK")
</pallas_src>

<mosaic_0001>
module attributes {stable_mosaic.version = 11 : i64} {
  func.func @_conv1x1_kernel(%arg0: i32, %arg1: i32, %arg2: memref<2x4xf32, #tpu.memory_space<vmem>>, %arg3: memref<4x128xf32, #tpu.memory_space<vmem>>, %arg4: memref<2x128xf32, #tpu.memory_space<vmem>>) attributes {dimension_semantics = [#tpu.dimension_semantics<parallel>, #tpu.dimension_semantics<parallel>], iteration_bounds = array<i64: 1, 1>, scalar_prefetch = 0 : i64, scratch_operands = 0 : i64, tpu.core_type = #tpu.core_type<tc>, window_params = [{transform_indices = @transform_0, window_bounds = array<i64: 2, 4>}, {transform_indices = @transform_1, window_bounds = array<i64: 4, 128>}, {transform_indices = @transform_2, window_bounds = array<i64: 2, 128>}]} {
    %c0 = arith.constant 0 : index
    %c0_0 = arith.constant 0 : index
    %0 = vector.load %arg2[%c0, %c0_0] : memref<2x4xf32, #tpu.memory_space<vmem>>, vector<2x4xf32>
    %c0_1 = arith.constant 0 : index
    %c0_2 = arith.constant 0 : index
    %1 = vector.load %arg3[%c0_1, %c0_2] : memref<4x128xf32, #tpu.memory_space<vmem>>, vector<4x128xf32>
    %cst = arith.constant dense<0.000000e+00> : vector<2x128xf32>
    %2 = tpu.matmul %0, %1, %cst {dimension_numbers = #tpu.dot_dimension_numbers<[1], [0], [0], [1], [0, 0, 1, 1], [], []>} : vector<2x4xf32>, vector<4x128xf32>, vector<2x128xf32> -> vector<2x128xf32>
    %c0_3 = arith.constant 0 : index
    %c0_4 = arith.constant 0 : index
    %3 = vector.load %arg4[%c0_3, %c0_4] : memref<2x128xf32, #tpu.memory_space<vmem>>, vector<2x128xf32>
    tpu.vector_store %arg4[%c0_3, %c0_4], %2 {strides = array<i32>} : memref<2x128xf32, #tpu.memory_space<vmem>>, vector<2x128xf32>,
    return
  }
  func.func @transform_0(%arg0: i32, %arg1: i32) -> (i32, i32) {
    %c0_i32 = arith.constant 0 : i32
    %c0_i32_0 = arith.constant 0 : i32
    return %arg0, %c0_i32 : i32, i32
  }
  func.func @transform_1(%arg0: i32, %arg1: i32) -> (i32, i32) {
    %c0_i32 = arith.constant 0 : i32
    %c0_i32_0 = arith.constant 0 : i32
    return %c0_i32, %arg1 : i32, i32
  }
  func.func @transform_2(%arg0: i32, %arg1: i32) -> (i32, i32) {
    %c0_i32 = arith.constant 0 : i32
    return %arg0, %arg1 : i32, i32
  }
}

</mosaic_0001>

<bundles_post_ra>
// kernel: tpu_custom_call.1
= control target key start
LH: loop header
LB: loop body
LE: loop exit
PB: predicated region body
PF: predicated region fallthrough
CT: control target
= control target key end

     0   :  { %7 = vsyncpa [#allocation3], 0  ;;  %s275_s0 = inlined_call_operand.hbm [shape: f32[2,4], index: 0, kind: input, shape index: {}]   ;;  %s276_s1 = inlined_call_operand.hbm [shape: f32[4,128], index: 1, kind: input, shape index: {}]   ;;  %s277_s2 = inlined_call_operand.hbm [shape: f32[2,128], index: 2, kind: output, shape index: {}]  }
   0x1   :  { %8 = vsyncpa [#allocation6], 0 }
   0x2   :  { %9 = vsyncpa [#allocation4], 0  ;;  %s219_s9 = smov [#allocation2]   ;;  %s220_s11 = smov [#allocation5]  }
   0x3   :  { %s16_s10 = sshll.u32 %s219_s9, 4  ;;  %s26_s12 = sshll.u32 %s220_s11, 4  ;;  %s17_s10 = int_to_ptr.vmem [resolvable:$true] %s16_s10  ;;  %s27_s12 = int_to_ptr.vmem [resolvable:$true] %s26_s12 }
   0x4   :  { %s147_s15 = scalar_lea.hbm %s275_s0, 32 }
   0x5   :  { %p148_p0 = scmp.ne.s32.totalorder %s275_s0, %s147_s15  ;;  %p151_p1 = scmp.lt.u32.totalorder %s147_s15, %s275_s0 }
   0x7   :  { %p153_p2 = pnand %p151_p1, %p148_p0 }
   0x9   :  { %156 = shalt.err (!%p153_p2)
}
   0xa   :  { %s157_s20 = scalar_lea.vmem %s17_s10, 32  ;;  %p162_p4 = scmp.lt.s32.totalorder %s17_s10, %s17_s10 }
   0xb   :  { %p158_p3 = scmp.ne.s32.totalorder %s17_s10, %s157_s20  ;;  %p163_p5 = scmp.lt.s32.totalorder %s157_s20, %s157_s20 }
   0xd   :  { %p164_p6 = por %p163_p5, %p162_p4 }
   0xf   :  { %p165_p7 = pnand %p164_p6, %p158_p3 }
  0x11   :  { %168 = shalt.err (!%p165_p7)
}
  0x12   :  { %19 = dma.hbm_to_vmem [thread:$0]  %s275_s0, 32, %s17_s10, [#allocation3]  }
  0x13   :  { %s169_s25 = scalar_lea.hbm %s276_s1, 64 }
  0x14   :  { %p170_p8 = scmp.ne.s32.totalorder %s276_s1, %s169_s25  ;;  %p173_p9 = scmp.lt.u32.totalorder %s169_s25, %s276_s1 }
  0x16   :  { %p175_p10 = pnand %p173_p9, %p170_p8 }
  0x18   :  { %178 = shalt.err (!%p175_p10)
}
  0x19   :  { %s179_s30 = scalar_lea.vmem %s27_s12, 64  ;;  %p184_p12 = scmp.lt.s32.totalorder %s27_s12, %s27_s12 }
  0x1a   :  { %p180_p11 = scmp.ne.s32.totalorder %s27_s12, %s179_s30  ;;  %p185_p13 = scmp.lt.s32.totalorder %s179_s30, %s179_s30 }
  0x1c   :  { %p186_p0 = por %p185_p13, %p184_p12 }
  0x1e   :  { %p187_p1 = pnand %p186_p0, %p180_p11 }
  0x20   :  { %190 = shalt.err (!%p187_p1)
}
  0x21   :  { %29 = dma.hbm_to_vmem [thread:$0]  %s276_s1, 64, %s27_s12, [#allocation6]  }
  0x22   :  { %213 = dma.done.wait [#allocation3], 32  }
  0x23   :  { %214 = vsyncadd [#allocation3], 4294967264 }
  0x24   :  { %215 = dma.done.wait [#allocation6], 64  }
  0x25   :  { %216 = vsyncadd [#allocation6], 4294967232  ;;  %v221_v0 = vmov 0.0   ;;  %vm222_vm0 = vmmov 0   ;;  %vm42_vm1 = vcmask 1043456   ;;  %vm38_vm2 = vcmask 31744  }
  0x26   :  { %137 = vmatprep.subr.mxu0 %v221_v0  ;;  %139 = vmatprep.mubr.msk.f32.mxu0 %vm222_vm0, %v221_v0  ;;  %v37_v1 = vld [vmem:[#allocation5] sm:$0xf]  ;;  %v36_v2 = vld [vmem:[#allocation2] sm:$0x3]  ;;  %s223_s4 = smov [#allocation7]  }
  0x27   :  { %138 = vmatpush3.msk.msra.mxu0 %vm42_vm1, %v37_v1  ;;  %s123_s5 = sshll.u32 %s223_s4, 4  ;;  %s124_s5 = int_to_ptr.vmem [resolvable:$true] %s123_s5 }
  0x28   :  { %140 = vmatmul.mubr.msk.f32.vlgmr.msra.gmra.mrb[0].mxu0 %vm38_vm2, %v36_v2  ;;  %s191_s1 = scalar_lea.vmem %s124_s5, 32  ;;  %p196_p3 = scmp.lt.s32.totalorder %s124_s5, %s124_s5 }
  0x29   :  { %p192_p2 = scmp.ne.s32.totalorder %s124_s5, %s191_s1  ;;  %p197_p4 = scmp.lt.s32.totalorder %s191_s1, %s191_s1 }
  0x2b   :  { %p198_p5 = por %p197_p4, %p196_p3 }
  0x2d   :  { %p199_p6 = pnand %p198_p5, %p192_p2 }
  0xfb   :  { %v112_v3 = vpop.f32.mrb[0].mxu0 }
  0xfc   :  { %116 = vst [vmem:[#allocation7] sm:$0x3] %v112_v3  ;;  %v141_v4 = vpop.f32.mrb[1].mxu0 }
  0xfd   :  { %202 = shalt.err (!%p199_p6)
}
  0xfe   :  { %s203_s8 = scalar_lea.hbm %s277_s2, 32 }
  0xff   :  { %p204_p7 = scmp.ne.s32.totalorder %s277_s2, %s203_s8  ;;  %p207_p8 = scmp.lt.u32.totalorder %s203_s8, %s277_s2 }
 0x101   :  { %p209_p9 = pnand %p207_p8, %p204_p7 }
 0x103   :  { %212 = shalt.err (!%p209_p9)
}
 0x104   :  { %126 = dma.vmem_to_hbm [thread:$0]  %s124_s5, 32, %s277_s2, [#allocation4]  }
 0x105   :  { %217 = dma.done.wait [#allocation4], 32  }
 0x106   :  { %218 = vsyncadd [#allocation4], 4294967264 }
 0x107   :  { %130 = vsyncpa [#allocation3], 1 }
 0x108   :  { %131 = vsyncpa [#allocation6], 1 }
 0x109   :  { %132 = vsyncpa [#allocation4], 1 }

</bundles_post_ra>
